<compile_context>
chip_gen: v7x
topology: tpu7x:2x2x1
jax: 0.10.0
libtpu: 0.0.40
codegen_flags: <defaults>
</compile_context>

<pallas_src>
import functools
import math

import jax
import jax.numpy as jnp
import numpy as np
from jax.experimental import pallas as pl
from jax.experimental.pallas import tpu as pltpu


def _cdiv(a, b):
    return -(-a // b)


def _pad_to(v, m):
    return _cdiv(v, m) * m


def _physical_vmem_bytes():
    """Best-effort per-core VMEM capacity query (None if undetectable)."""
    try:
        info = pltpu.get_tpu_info()
        for attr in ("vmem_capacity_bytes", "vmem_size_bytes", "vmem_bytes"):
            v = getattr(info, attr, None)
            if v:
                return int(v)
    except Exception:
        pass
    return None


def _vmem_block_bytes(*, s, Hq, Wout, K, KH, Cout_p, tile_rows,
                      in_bytes, out_bytes):
    """Rough VMEM footprint of the pipelined blocks (with lane/sublane padding)."""
    x_blk = s * Hq * _pad_to(Wout, 16) * _pad_to(K, 128) * in_bytes
    w_blk = KH * _pad_to(K, 16) * _pad_to(Cout_p, 128) * in_bytes
    sb_blk = 2 * 8 * _pad_to(Cout_p, 128) * 4
    o_blk = _pad_to(tile_rows, 16) * _pad_to(Cout_p, 128) * out_bytes
    acc = _pad_to(tile_rows, 8) * _pad_to(Cout_p, 128) * 4  # f32 accumulator value
    return 2 * (x_blk + w_blk + sb_blk + o_blk) + acc       # default double-buffering


def _pick_vmem_limit(block_bytes, phys_vmem):
    """Generation-aware scoped-VMEM request with headroom below physical."""
    if phys_vmem:
        cap = min(phys_vmem * 3 // 4, 96 * 1024 * 1024)   # 48 MiB on v7x, 96 MiB v5e/v6e
    else:
        cap = 48 * 1024 * 1024                             # safe everywhere
    want = int(1.5 * block_bytes) + (8 << 20)
    return max(32 << 20, min(want, cap))


def _conv_bn_relu6_kernel(x_ref, w_ref, scale_ref, bias_ref, o_ref, *,
                          KH, S, TH, WOUT, K):
    # x_ref:     (S, Hq, WOUT, K)   H-phase-decomposed, W-im2col'ed image (bf16),
    #                               K = KW*Cin packed into the lane dim.
    # w_ref:     (KH, K, Cout_p)    per-row-tap weights (bf16)
    # scale_ref: (1, Cout_p)        folded BN scale (f32)
    # bias_ref:  (1, Cout_p)        folded BN bias  (f32)
    # o_ref:     (TH*WOUT, Cout_p)  output tile (bf16)
    r = pl.program_id(1)
    row0 = r * TH                                  # first output row of this tile
    acc = None
    for kh in range(KH):
        # Only the (non-minor) row dim is sliced dynamically; the minor
        # (WOUT, K) dims are taken at full extent -> no relayout copies.
        lhs = x_ref[kh % S, pl.ds(row0 + kh // S, TH), :, :]
        lhs = lhs.reshape(TH * WOUT, K)
        part = jnp.dot(lhs, w_ref[kh], preferred_element_type=jnp.float32)
        acc = part if acc is None else acc + part
    # fused eval-mode BatchNorm (folded) + ReLU6 epilogue, f32, then bf16 store.
    y = acc * scale_ref[...] + bias_ref[...]
    o_ref[...] = jnp.minimum(jnp.maximum(y, 0.0), 6.0).astype(o_ref.dtype)


def conv_block_forward(x_nchw, weight, gamma, beta, running_mean, running_var,
                       stride=1, eps=1e-5, tile_rows_target=None,
                       compute_dtype=jnp.bfloat16, out_dtype=jnp.bfloat16):
    N, Cin, H, W = (int(d) for d in x_nchw.shape)
    Cout, _, KH, KW = (int(d) for d in weight.shape)
    s = int(stride)
    pad = 1
    Hout = (H + 2 * pad - KH) // s + 1
    Wout = (W + 2 * pad - KW) // s + 1
    K = KW * Cin                                   # packed contraction depth
    Cout_p = _cdiv(Cout, 128) * 128                # lane-dense output channels

    # ---- generation-aware tile target ----------------------------------------
    phys_vmem = _physical_vmem_bytes()
    if tile_rows_target is None:
        if phys_vmem and phys_vmem >= (96 << 20):
            tile_rows_target = 2048                # v5e/v6e: 128 MiB VMEM
        elif phys_vmem:
            tile_rows_target = 512                 # v7x: 64 MiB VMEM per core
        else:
            tile_rows_target = 1024

    # ---- output-row tiling (M = N*Hout*Wout rows of the GEMM) ----------------
    th = max(1, min(Hout, tile_rows_target // max(1, Wout)))
    need = 16 // math.gcd(Wout, 16)                # tile_rows % 16 == 0 (bf16 out)
    th = _cdiv(th, need) * need
    nrt = _cdiv(Hout, th)
    Hout_p = nrt * th
    tile_rows = th * Wout

    # ---- geometry: stride handled by H-phase decomposition + strided W im2col -
    qh_max = (KH - 1) // s
    Hq = Hout_p + qh_max
    Hpad = s * Hq
    Wpad = s * (Wout - 1) + KW

    # NCHW -> NHWC, single jnp.pad for conv halo + tiling fill, bf16 operands.
    x = jnp.transpose(x_nchw, (0, 2, 3, 1)).astype(compute_dtype)
    h_keep = min(H, Hpad - pad)                    # safe: dropped rows/cols are
    w_keep = min(W, Wpad - pad)                    # never read by any valid output
    xp = jnp.pad(x[:, :h_keep, :w_keep, :],
                 ((0, 0),
                  (pad, Hpad - pad - h_keep),
                  (pad, Wpad - pad - w_keep),
                  (0, 0)))

    # im2col along W only (stride folded into the slice): last dim = KW*Cin.
    # TODO(synk): for very small Cin the K=KW*Cin lane dim is still < 128 and
    #             pads in VMEM; folding more of W into the lane dim would fix it.
    cols = [jax.lax.slice_in_dim(xp, kw, kw + s * (Wout - 1) + 1, stride=s, axis=2)
            for kw in range(KW)]
    xcol = jnp.stack(cols, axis=3).reshape(N, Hpad, Wout, K)

    # H-direction phase decomposition (identity / free reshape when stride == 1).
    if s == 1:
        xph = xcol.reshape(N, Hq, Wout, K)
    else:
        xph = xcol.reshape(N, Hq, s, Wout, K)
        xph = jnp.transpose(xph, (0, 2, 1, 3, 4)).reshape(N * s, Hq, Wout, K)

    # weights (Cout, Cin, KH, KW) -> (KH, KW*Cin, Cout_p), bf16.
    w2 = jnp.transpose(weight, (2, 3, 1, 0)).reshape(KH, K, Cout)
    w2 = jnp.pad(w2, ((0, 0), (0, 0), (0, Cout_p - Cout))).astype(compute_dtype)

    # Fold eval-mode BatchNorm into per-channel scale/bias (kept f32).
    # TODO(synk): training-mode BatchNorm (per-batch statistics) not implemented;
    #             running statistics are used (standard inference fusion).
    scale = (gamma.astype(jnp.float32) /
             jnp.sqrt(running_var.astype(jnp.float32) + eps))
    bias = beta.astype(jnp.float32) - running_mean.astype(jnp.float32) * scale
    scale2 = jnp.pad(scale, (0, Cout_p - Cout)).reshape(1, Cout_p)
    bias2 = jnp.pad(bias, (0, Cout_p - Cout)).reshape(1, Cout_p)

    vmem_limit = _pick_vmem_limit(
        _vmem_block_bytes(s=s, Hq=Hq, Wout=Wout, K=K, KH=KH, Cout_p=Cout_p,
                          tile_rows=tile_rows,
                          in_bytes=jnp.dtype(compute_dtype).itemsize,
                          out_bytes=jnp.dtype(out_dtype).itemsize),
        phys_vmem)

    kernel = functools.partial(_conv_bn_relu6_kernel, KH=KH, S=s, TH=th,
                               WOUT=Wout, K=K)

    out = pl.pallas_call(
        kernel,
        out_shape=jax.ShapeDtypeStruct((N * Hout_p * Wout, Cout_p), out_dtype),
        grid=(N, nrt),
        in_specs=[
            # whole per-batch (phase-decomposed, W-packed) image: block index
            # changes only with n, so it stays VMEM-resident across the r axis.
            pl.BlockSpec((s, Hq, Wout, K), lambda n, r: (n, 0, 0, 0)),
            # grid-invariant operands (could be pl.Buffered(1) on v7x).
            pl.BlockSpec((KH, K, Cout_p), lambda n, r: (0, 0, 0)),
            pl.BlockSpec((1, Cout_p), lambda n, r: (0, 0)),
            pl.BlockSpec((1, Cout_p), lambda n, r: (0, 0)),
        ],
        out_specs=pl.BlockSpec((tile_rows, Cout_p), lambda n, r: (n * nrt + r, 0)),
        compiler_params=pltpu.CompilerParams(
            # keep the megacore split on the batch axis when N > 1 so each core
            # holds a single per-batch image; otherwise allow splitting on r.
            dimension_semantics=(("parallel", "arbitrary") if N > 1
                                 else ("parallel", "parallel")),
            vmem_limit_bytes=vmem_limit),
    )(xph, w2, scale2, bias2)

    out = out.reshape(N, Hout_p, Wout, Cout_p)[:, :Hout, :, :Cout]
    return jnp.transpose(out, (0, 3, 1, 2))        # back to NCHW (bf16)


if __name__ == "__main__":
    key = jax.random.PRNGKey(0)
    k_x, k_w, k_g, k_b, k_m, k_v = jax.random.split(key, 6)

    N, Cin, H, W = 2, 4, 16, 16
    Cout = 8

    x = jax.random.normal(k_x, (N, Cin, H, W), dtype=jnp.float32)
    weight = jax.random.normal(k_w, (Cout, Cin, 3, 3), dtype=jnp.float32) * 0.1
    gamma = jax.random.uniform(k_g, (Cout,), minval=0.5, maxval=1.5)
    beta = jax.random.normal(k_b, (Cout,)) * 0.1
    running_mean = jax.random.normal(k_m, (Cout,)) * 0.1
    running_var = jax.random.uniform(k_v, (Cout,), minval=0.5, maxval=1.5)

    def reference(stride):
        r = jax.lax.conv_general_dilated(
            x, weight, window_strides=(stride, stride),
            padding=((1, 1), (1, 1)),
            dimension_numbers=("NCHW", "OIHW", "NCHW"))
        sc = gamma / jnp.sqrt(running_var + 1e-5)
        b = beta - running_mean * sc
        return jnp.clip(r * sc[None, :, None, None] + b[None, :, None, None], 0.0, 6.0)

    for stride in (1, 2):
        y = conv_block_forward(x, weight, gamma, beta, running_mean, running_var,
                               stride=stride)
        y = jax.block_until_ready(y)
        ref = np.asarray(reference(stride), dtype=np.float32)
        y_f32 = np.asarray(y.astype(jnp.float32))
        assert y.shape == ref.shape == (N, Cout, H // stride, W // stride)
        # bf16 operands + bf16 output with f32 accumulation vs f32 reference.
        err = np.max(np.abs(y_f32 - ref))
        assert np.allclose(y_f32, ref, rtol=5e-2, atol=5e-2), \
            f"stride={stride} max abs err = {err}"

    print("KERNEL_OK")
</pallas_src>

<mosaic_0001>
module attributes {stable_mosaic.version = 11 : i64} {
  func.func @_conv_bn_relu6_kernel(%arg0: i32, %arg1: i32, %arg2: memref<1x18x16x12xbf16, #tpu.memory_space<vmem>>, %arg3: memref<3x12x128xbf16, #tpu.memory_space<vmem>>, %arg4: memref<1x128xf32, #tpu.memory_space<vmem>>, %arg5: memref<1x128xf32, #tpu.memory_space<vmem>>, %arg6: memref<256x128xbf16, #tpu.memory_space<vmem>>) attributes {dimension_semantics = [#tpu.dimension_semantics<parallel>, #tpu.dimension_semantics<arbitrary>], iteration_bounds = array<i64: 2, 1>, scalar_prefetch = 0 : i64, scratch_operands = 0 : i64, tpu.core_type = #tpu.core_type<tc>, window_params = [{transform_indices = @transform_0, window_bounds = array<i64: 1, 18, 16, 12>}, {pipeline_mode = #tpu.pipeline_mode<synchronous>, transform_indices = @transform_1, window_bounds = array<i64: 3, 12, 128>}, {pipeline_mode = #tpu.pipeline_mode<synchronous>, transform_indices = @transform_2, window_bounds = array<i64: 1, 128>}, {pipeline_mode = #tpu.pipeline_mode<synchronous>, transform_indices = @transform_3, window_bounds = array<i64: 1, 128>}, {transform_indices = @transform_4, window_bounds = array<i64: 256, 128>}]} {
    %c16_i32 = arith.constant 16 : i32
    %0 = arith.muli %arg1, %c16_i32 : i32
    %c0_i32 = arith.constant 0 : i32
    %1 = arith.addi %0, %c0_i32 : i32
    %c0 = arith.constant 0 : index
    %2 = arith.index_cast %1 : i32 to index
    %c0_0 = arith.constant 0 : index
    %c0_1 = arith.constant 0 : index
    %3 = vector.load %arg2[%c0, %2, %c0_0, %c0_1] : memref<1x18x16x12xbf16, #tpu.memory_space<vmem>>, vector<1x16x16x12xbf16>
    %4 = vector.shape_cast %3 : vector<1x16x16x12xbf16> to vector<16x16x12xbf16>
    %5 = vector.shape_cast %4 : vector<16x16x12xbf16> to vector<256x12xbf16>
    %c0_2 = arith.constant 0 : index
    %c0_3 = arith.constant 0 : index
    %c0_4 = arith.constant 0 : index
    %6 = vector.load %arg3[%c0_2, %c0_3, %c0_4] : memref<3x12x128xbf16, #tpu.memory_space<vmem>>, vector<1x12x128xbf16>
    %7 = vector.shape_cast %6 : vector<1x12x128xbf16> to vector<12x128xbf16>
    %cst = arith.constant dense<0.000000e+00> : vector<256x128xf32>
    %8 = tpu.matmul %5, %7, %cst {dimension_numbers = #tpu.dot_dimension_numbers<[1], [0], [0], [1], [0, 0, 1, 1], [], []>} : vector<256x12xbf16>, vector<12x128xbf16>, vector<256x128xf32> -> vector<256x128xf32>
    %c1_i32 = arith.constant 1 : i32
    %9 = arith.addi %0, %c1_i32 : i32
    %c0_5 = arith.constant 0 : index
    %10 = arith.index_cast %9 : i32 to index
    %c0_6 = arith.constant 0 : index
    %c0_7 = arith.constant 0 : index
    %11 = vector.load %arg2[%c0_5, %10, %c0_6, %c0_7] : memref<1x18x16x12xbf16, #tpu.memory_space<vmem>>, vector<1x16x16x12xbf16>
    %12 = vector.shape_cast %11 : vector<1x16x16x12xbf16> to vector<16x16x12xbf16>
    %13 = vector.shape_cast %12 : vector<16x16x12xbf16> to vector<256x12xbf16>
    %c1 = arith.constant 1 : index
    %c0_8 = arith.constant 0 : index
    %c0_9 = arith.constant 0 : index
    %14 = vector.load %arg3[%c1, %c0_8, %c0_9] : memref<3x12x128xbf16, #tpu.memory_space<vmem>>, vector<1x12x128xbf16>
    %15 = vector.shape_cast %14 : vector<1x12x128xbf16> to vector<12x128xbf16>
    %cst_10 = arith.constant dense<0.000000e+00> : vector<256x128xf32>
    %16 = tpu.matmul %13, %15, %cst_10 {dimension_numbers = #tpu.dot_dimension_numbers<[1], [0], [0], [1], [0, 0, 1, 1], [], []>} : vector<256x12xbf16>, vector<12x128xbf16>, vector<256x128xf32> -> vector<256x128xf32>
    %17 = arith.addf %8, %16 : vector<256x128xf32>
    %c2_i32 = arith.constant 2 : i32
    %18 = arith.addi %0, %c2_i32 : i32
    %c0_11 = arith.constant 0 : index
    %19 = arith.index_cast %18 : i32 to index
    %c0_12 = arith.constant 0 : index
    %c0_13 = arith.constant 0 : index
    %20 = vector.load %arg2[%c0_11, %19, %c0_12, %c0_13] : memref<1x18x16x12xbf16, #tpu.memory_space<vmem>>, vector<1x16x16x12xbf16>
    %21 = vector.shape_cast %20 : vector<1x16x16x12xbf16> to vector<16x16x12xbf16>
    %22 = vector.shape_cast %21 : vector<16x16x12xbf16> to vector<256x12xbf16>
    %c2 = arith.constant 2 : index
    %c0_14 = arith.constant 0 : index
    %c0_15 = arith.constant 0 : index
    %23 = vector.load %arg3[%c2, %c0_14, %c0_15] : memref<3x12x128xbf16, #tpu.memory_space<vmem>>, vector<1x12x128xbf16>
    %24 = vector.shape_cast %23 : vector<1x12x128xbf16> to vector<12x128xbf16>
    %cst_16 = arith.constant dense<0.000000e+00> : vector<256x128xf32>
    %25 = tpu.matmul %22, %24, %cst_16 {dimension_numbers = #tpu.dot_dimension_numbers<[1], [0], [0], [1], [0, 0, 1, 1], [], []>} : vector<256x12xbf16>, vector<12x128xbf16>, vector<256x128xf32> -> vector<256x128xf32>
    %26 = arith.addf %17, %25 : vector<256x128xf32>
    %c0_17 = arith.constant 0 : index
    %c0_18 = arith.constant 0 : index
    %27 = vector.load %arg4[%c0_17, %c0_18] : memref<1x128xf32, #tpu.memory_space<vmem>>, vector<1x128xf32>
    %28 = vector.broadcast %27 : vector<1x128xf32> to vector<256x128xf32>
    %29 = arith.mulf %26, %28 : vector<256x128xf32>
    %c0_19 = arith.constant 0 : index
    %c0_20 = arith.constant 0 : index
    %30 = vector.load %arg5[%c0_19, %c0_20] : memref<1x128xf32, #tpu.memory_space<vmem>>, vector<1x128xf32>
    %31 = vector.broadcast %30 : vector<1x128xf32> to vector<256x128xf32>
    %32 = arith.addf %29, %31 : vector<256x128xf32>
    %cst_21 = arith.constant 0.000000e+00 : f32
    %33 = vector.broadcast %cst_21 : f32 to vector<256x128xf32>
    %34 = arith.maximumf %32, %33 : vector<256x128xf32>
    %cst_22 = arith.constant 6.000000e+00 : f32
    %35 = vector.broadcast %cst_22 : f32 to vector<256x128xf32>
    %36 = arith.minimumf %34, %35 : vector<256x128xf32>
    %37 = arith.truncf %36 : vector<256x128xf32> to vector<256x128xbf16>
    %c0_23 = arith.constant 0 : index
    %c0_24 = arith.constant 0 : index
    %38 = vector.load %arg6[%c0_23, %c0_24] : memref<256x128xbf16, #tpu.memory_space<vmem>>, vector<256x128xbf16>
    tpu.vector_store %arg6[%c0_23, %c0_24], %37 {strides = array<i32>} : memref<256x128xbf16, #tpu.memory_space<vmem>>, vector<256x128xbf16>,
    return
  }
  func.func @transform_0(%arg0: i32, %arg1: i32) -> (i32, i32, i32, i32) {
    %c0_i32 = arith.constant 0 : i32
    %c0_i32_0 = arith.constant 0 : i32
    %c0_i32_1 = arith.constant 0 : i32
    %c0_i32_2 = arith.constant 0 : i32
    return %arg0, %c0_i32, %c0_i32_0, %c0_i32_1 : i32, i32, i32, i32
  }
  func.func @transform_1(%arg0: i32, %arg1: i32) -> (i32, i32, i32) {
    %c0_i32 = arith.constant 0 : i32
    %c0_i32_0 = arith.constant 0 : i32
    %c0_i32_1 = arith.constant 0 : i32
    %c0_i32_2 = arith.constant 0 : i32
    return %c0_i32, %c0_i32_0, %c0_i32_1 : i32, i32, i32
  }
  func.func @transform_2(%arg0: i32, %arg1: i32) -> (i32, i32) {
    %c0_i32 = arith.constant 0 : i32
    %c0_i32_0 = arith.constant 0 : i32
    %c0_i32_1 = arith.constant 0 : i32
    return %c0_i32, %c0_i32_0 : i32, i32
  }
  func.func @transform_3(%arg0: i32, %arg1: i32) -> (i32, i32) {
    %c0_i32 = arith.constant 0 : i32
    %c0_i32_0 = arith.constant 0 : i32
    %c0_i32_1 = arith.constant 0 : i32
    return %c0_i32, %c0_i32_0 : i32, i32
  }
  func.func @transform_4(%arg0: i32, %arg1: i32) -> (i32, i32) {
    %c1_i32 = arith.constant 1 : i32
    %0 = arith.muli %arg0, %c1_i32 : i32
    %1 = arith.addi %0, %arg1 : i32
    %c0_i32 = arith.constant 0 : i32
    %c0_i32_0 = arith.constant 0 : i32
    return %1, %c0_i32 : i32, i32
  }
}

</mosaic_0001>

<bundles_post_ra>
// kernel: tpu_custom_call.1
= control target key start
LH: loop header
LB: loop body
LE: loop exit
PB: predicated region body
PF: predicated region fallthrough
CT: control target
= control target key end

     0   :  { %9 = vsyncpa [#allocation3], 0  ;;  %s2780_s0 = inlined_call_operand.vmem [shape: bf16[2,18,16,12], index: 0, kind: input, shape index: {}]   ;;  %s2781_s1 = inlined_call_operand.vmem [shape: bf16[3,12,128], index: 1, kind: input, shape index: {}]   ;;  %s2782_s2 = inlined_call_operand.vmem [shape: f32[1,128], index: 2, kind: input, shape index: {}]   ;;  %s2783_s3 = inlined_call_operand.vmem [shape: f32[1,128], index: 3, kind: input, shape index: {}]   ;;  %s2784_s4 = inlined_call_operand.hbm [shape: bf16[512,128], index: 4, kind: output, shape index: {}]  }
   0x1   :  { %11 = vsyncpa [#allocation3 + $0x1], 0  ;;  %s2433_s15 = smov 0   ;;  %s2435_s16 = smov 0  }
   0x2   :  { %s2437_s17 = smov 0   ;;  %s2439_s18 = smov 0  }
   0x3   :  { %s2441_s19 = smov 0   ;;  %s2443_s20 = smov 0  }
   0x4 LB: > { %s1652_s21 = sadd.s32 4294967295, %s2403_s20   ;;  %s1653_s22 = sadd.s32 4294967294, %s2403_s20   ;;  %s2403_s20 = sphi %s2443_s20, %s17_s20   ;;  %s2399_s19 = sphi %s2441_s19, %s2791_s19   ;;  %s2395_s18 = sphi %s2439_s18, %s2790_s18   ;;  %s2391_s17 = sphi %s2437_s17, %s2789_s17   ;;  %s2387_s16 = sphi %s2435_s16, %s2788_s16   ;;  %s2383_s15 = sphi %s2433_s15, %s2787_s15  }
   0x5   : > { %s29_s23 = sadd.s32 1, %s2399_s19  ;;  %s127_s24 = sadd.s32 1, %s2391_s17 }
   0x6   : > { %p31_p0 = scmp.ge.s32.totalorder %s29_s23, 2  ;;  %p137_p1 = scmp.ne.s32.totalorder %s2391_s17, %s2387_s16 }
   0x7   : > { %p138_p2 = scmp.eq.s32.totalorder %s1652_s21, 1  ;;  %p143_p3 = scmp.ne.s32.totalorder %s2387_s16, %s2383_s15 }
   0x8   : > { %s2793_s23 = smov (%p31_p0, %s29_s23), 0  ;;  %p144_p5 = scmp.eq.s32.totalorder %s1653_s22, 1 }
   0x9   : > { %p2473_p4 = por %p138_p2, %p137_p1  ;;  %s124_s26 = ssub.s32 %s2399_s19, %s2793_s23 }
   0xa   : > { %p1656_p6 = scmp.ge.s32.totalorder %s2403_s20, 1  ;;  %p125_p7 = scmp.eq.s32.totalorder %s124_s26, 0 }
   0xb   : > { %p2480_p8 = por %p144_p5, %p143_p3  ;;  %p179_p9 = scmp.lt.s32.totalorder %s2403_s20, 3 }
   0xc   : > { %s2486_s28 = scalar_select %p125_p7, %s2391_s17, %s127_s24  }
   0xd   : > { %p180_p10 = pnand %p1656_p6, %p179_p9 }
   0xe   : > { %v2274_v0 = vld [vmem:[%s2781_s1 + $0x8] sm:$0x3f] (!%p180_p10)   ;;  %vm424_vm0 = vcmask (!%p180_p10), 1045504   ;;  %p205_p11 = scmp.lt.s32.totalorder (!%p180_p10), %s2395_s18, 1  ;;  %v2275_v1 = vld [vmem:[%s2781_s1] sm:$0x3f] (!%p180_p10)  }
   0xf   : > { %183 = sbr.rel (%p180_p10) target bundleno = 359 (0x167), region = 36  ;;  %2212 = vmatprep.subr.msk.bf16.mxu1 (!%p180_p10), %vm424_vm0, %v2274_v0  ;;  %v426_v2 = vsel (!%p180_p10), %vm424_vm0, %v2274_v0, 0  ;;  %v2278_v3 = vld [vmem:[%s2781_s1 + $0x10] sm:$0x3f] (!%p180_p10)   ;;  %2213 = vmatprep.subr.msk.bf16.mxu0 (!%p180_p10), %vm424_vm0, %v2275_v1  ;;  %v723_v4 = vsel (!%p180_p10), %vm424_vm0, %v2275_v1, 0  ;;  %vm375_vm1 = vcmask (!%p180_p10), 97280  }
  0x10   : > { %2045 = vmatpush3.bf16.msra.mxu1 (!%p180_p10), %v426_v2  ;;  %2079 = vmatpush3.bf16.msra.mxu0 (!%p180_p10), %v723_v4  ;;  %v1059_v9 = vsel (!%p180_p10), %vm424_vm0, %v2278_v3, 0  ;;  %s202_s26 = sand.u32 (!%p180_p10), 1, %s2387_s16   ;;  %s1897_s5 = sshll.u32 (!%p180_p10), %s2395_s18, 11 }
  0x11   : > { %2214 = vmatprep.subr.msk.bf16.mxu1 (!%p180_p10), %vm424_vm0, %v2275_v1  ;;  %2215 = vmatprep.subr.msk.bf16.mxu0 (!%p180_p10), %vm424_vm0, %v2278_v3  ;;  %s1657_s29 = sshll.u32 (!%p180_p10), %s202_s26, 7  ;;  %s2726_s9 = scalar_lea.hbm (!%p180_p10), %s2784_s4, %s1897_s5 }
  0x12   : > { %s2648_s30 = scalar_lea.vmem (!%p180_p10), [#allocation2], %s1657_s29  ;;  %s2405_s11 = smov (!%p180_p10), [#allocation2]  }
  0x13   : > { %s1571_s6 = sshll.u32 (!%p180_p10), %s2648_s30, 4  ;;  %s2329_s12 = sshll.u32 (!%p180_p10), %s2405_s11, 4  ;;  %s2728_s6 = int_to_ptr.vmem [resolvable:$true] %s1571_s6  ;;  %s2330_s12 = int_to_ptr.vmem [resolvable:$false] %s2329_s12 }
  0x14   : > { %p2332_p1 = scmp.lt.s32.totalorder (!%p180_p10), %s2728_s6, %s2330_s12 }
  0x16   : > { %s206_s7 = scalar_select %p205_p11, %s2395_s18, 1 }
  0x17   : > { %s2734_s18 = scalar_lea.sflag [#allocation3], %s202_s26 }
  0x18   : > { %s2216_s10 = smul.u32 144, %s206_s7 }
  0x1a   : > { %s2508_s13 = scalar_lea.vmem %s2780_s0, %s2216_s10  ;;  %s2325_s10 = scalar_lea.vmem %s2728_s6, 2048 }
  0x1b   : > { %v2276_v5 = vld [vmem:[%s2508_s13 + $0x8] sm:$0xff]   ;;  %v2277_v6 = vld [vmem:[%s2508_s13] sm:$0xff]   ;;  %v2279_v7 = vld [vmem:[%s2508_s13 + $0x10] sm:$0xff]   ;;  %p2326_p12 = scmp.ne.s32.totalorder %s2728_s6, %s2325_s10 }
  0x1c   : > { %2046 = vmatprep.mubr.msk.bf16.mxu1 %vm375_vm1, %v2276_v5  ;;  %2080 = vmatprep.mubr.msk.bf16.mxu0 %vm375_vm1, %v2277_v6  ;;  %v2280_v8 = vld [vmem:[%s2508_s13 + $0x8] sm:$0xff]   ;;  %v2281_v10 = vld [vmem:[%s2508_s13 + $0x18] sm:$0xff]   ;;  %v2282_v11 = vld [vmem:[%s2508_s13 + $0x10] sm:$0xff]  }
  0x1d   : > { %2047 = vmatmul.mubr.msk.bf16.vlgmr.msra.gmra.mrb[0].mxu1 %vm375_vm1, %v2279_v7  ;;  %2081 = vmatmul.mubr.msk.bf16.vlgmr.msra.gmra.mrb[0].mxu0 %vm375_vm1, %v2280_v8  ;;  %v2283_v12 = vld [vmem:[%s2508_s13 + $0x20] sm:$0xff]   ;;  %v2284_v13 = vld [vmem:[%s2508_s13 + $0x18] sm:$0xff]   ;;  %v2285_v14 = vld [vmem:[%s2508_s13 + $0x28] sm:$0xff]   ;;  %p2327_p13 = pnand %p2326_p12, %p2473_p4 }
  0x1e   : > { %2147 = vmatpush3.bf16.msra.mxu1 %v723_v4  ;;  %2113 = vmatpush3.bf16.msra.mxu0 %v1059_v9  ;;  %v2286_v15 = vld [vmem:[%s2508_s13 + $0x20] sm:$0xff]   ;;  %v2287_v16 = vld [vmem:[%s2508_s13 + $0x30] sm:$0xff]   ;;  %v2288_v17 = vld [vmem:[%s2508_s13 + $0x28] sm:$0xff]  }
  0x1f   : > { %2050 = vmatprep.mubr.msk.bf16.mxu1 %vm375_vm1, %v2281_v10  ;;  %2084 = vmatprep.mubr.msk.bf16.mxu0 %vm375_vm1, %v2282_v11  ;;  %v2289_v18 = vld [vmem:[%s2508_s13 + $0x38] sm:$0xff]   ;;  %v2290_v19 = vld [vmem:[%s2508_s13 + $0x30] sm:$0xff]   ;;  %v2291_v20 = vld [vmem:[%s2508_s13 + $0x40] sm:$0xff]   ;;  %p2328_p0 = pneg %p2327_p13 }
  0x20   : > { %v2292_v21 = vld [vmem:[%s2508_s13 + $0x38] sm:$0xff]   ;;  %v2293_v22 = vld [vmem:[%s2508_s13 + $0x48] sm:$0xff]   ;;  %v2294_v23 = vld [vmem:[%s2508_s13 + $0x10] sm:$0xff]  }
  0x21   : > { %v2295_v24 = vld [vmem:[%s2508_s13 + $0x50] sm:$0xff]   ;;  %v2296_v25 = vld [vmem:[%s2508_s13 + $0x18] sm:$0xff]   ;;  %v2298_v27 = vld [vmem:[%s2508_s13 + $0x20] sm:$0xff]  }
  0x22   : > { %v2297_v26 = vld [vmem:[%s2508_s13 + $0x58] sm:$0xff]   ;;  %v2299_v28 = vld [vmem:[%s2508_s13 + $0x60] sm:$0xff]   ;;  %v2300_v29 = vld [vmem:[%s2508_s13 + $0x28] sm:$0xff]  }
  0x23   : > { %v2301_v30 = vld [vmem:[%s2508_s13 + $0x68] sm:$0xff]   ;;  %v2302_v31 = vld [vmem:[%s2508_s13 + $0x30] sm:$0xff]   ;;  %v2304_v33 = vld [vmem:[%s2508_s13 + $0x38] sm:$0xff]  }
  0x24   : > { %v2303_v32 = vld [vmem:[%s2508_s13 + $0x70] sm:$0xff]   ;;  %v2305_v34 = vld [vmem:[%s2508_s13 + $0x78] sm:$0xff]   ;;  %v2306_v35 = vld [vmem:[%s2508_s13 + $0x40] sm:$0xff]  }
  0x25   : > { %2051 = vmatmul.mubr.msk.bf16.gmra.mrb[4].mxu1 %vm375_vm1, %v2283_v12  ;;  %2085 = vmatmul.mubr.msk.bf16.gmra.mrb[4].mxu0 %vm375_vm1, %v2284_v13  ;;  %v2307_v36 = vld [vmem:[%s2508_s13 + $0x80] sm:$0xff]   ;;  %v2308_v37 = vld [vmem:[%s2508_s13 + $0x48] sm:$0xff]   ;;  %v2310_v39 = vld [vmem:[%s2508_s13 + $0x50] sm:$0xff]  }
  0x26   : > { %2054 = vmatprep.mubr.msk.bf16.mxu1 %vm375_vm1, %v2285_v14  ;;  %2088 = vmatprep.mubr.msk.bf16.mxu0 %vm375_vm1, %v2286_v15  ;;  %v2309_v38 = vld [vmem:[%s2508_s13 + $0x40] sm:$0xff]   ;;  %v2311_v40 = vld [vmem:[%s2508_s13 + $0x48] sm:$0xff]   ;;  %v2312_v41 = vld [vmem:[%s2508_s13 + $0x58] sm:$0xff]  }
  0x27   : > { %v2313_v42 = vld [vmem:[%s2508_s13 + $0x50] sm:$0xff]   ;;  %v2314_v43 = vld [vmem:[%s2508_s13 + $0x60] sm:$0xff]   ;;  %v2315_v44 = vld [vmem:[%s2508_s13 + $0x58] sm:$0xff]  }
  0x28   : > { %v2316_v45 = vld [vmem:[%s2508_s13 + $0x68] sm:$0xff]   ;;  %v2317_v46 = vld [vmem:[%s2508_s13 + $0x60] sm:$0xff]   ;;  %v2318_v47 = vld [vmem:[%s2508_s13 + $0x70] sm:$0xff]  }
  0x29   : > { %v2319_v48 = vld [vmem:[%s2508_s13 + $0x68] sm:$0xff]   ;;  %v2320_v49 = vld [vmem:[%s2508_s13 + $0x78] sm:$0xff]   ;;  %v2321_v50 = vld [vmem:[%s2508_s13 + $0x70] sm:$0xff]  }
  0x2a   : > { %v2322_v51 = vld [vmem:[%s2508_s13 + $0x80] sm:$0xff]   ;;  %v2323_v52 = vld [vmem:[%s2508_s13 + $0x78] sm:$0xff]   ;;  %v2324_v53 = vld [vmem:[%s2508_s13 + $0x88] sm:$0xff]   ;;  %s2331_s13 = scalar_lea.vmem %s2330_s12, 4096 }
  0x2b   : > { %v2624_v7 = vld [vmem:[%s2782_s2] ss:$0 sm:$0xff]  ;;  %p2333_p2 = scmp.lt.s32.totalorder %s2331_s13, %s2325_s10 }
  0x2c   : > { %v2629_v10 = vld [vmem:[%s2783_s3] ss:$0 sm:$0xff] }
  0x2d   : > { %2055 = vmatmul.mubr.msk.bf16.gmra.mrb[8].mxu1 %vm375_vm1, %v2287_v16  ;;  %2089 = vmatmul.mubr.msk.bf16.gmra.mrb[8].mxu0 %vm375_vm1, %v2288_v17  ;;  %p2334_p3 = por %p2333_p2, %p2332_p1 }
  0x2e   : > { %2058 = vmatprep.mubr.msk.bf16.mxu1 %vm375_vm1, %v2289_v18  ;;  %2092 = vmatprep.mubr.msk.bf16.mxu0 %vm375_vm1, %v2290_v19 }
  0x2f   : > { %p2335_p5 = pnand %p2334_p3, %p2328_p0 }
  0x35   : > { %2059 = vmatmul.mubr.msk.bf16.gmra.mrb[12].mxu1 %vm375_vm1, %v2291_v20  ;;  %2093 = vmatmul.mubr.msk.bf16.gmra.mrb[12].mxu0 %vm375_vm1, %v2292_v21 }
  0x36   : > { %2062 = vmatprep.mubr.msk.bf16.mxu1 %vm375_vm1, %v2293_v22  ;;  %2114 = vmatprep.mubr.msk.bf16.mxu0 %vm375_vm1, %v2294_v23 }
  0x3d   : > { %2063 = vmatmul.mubr.msk.bf16.gmra.mrb[16].mxu1 %vm375_vm1, %v2295_v24  ;;  %2115 = vmatmul.mubr.msk.bf16.vlgmr.msra.gmra.mrb[0].mxu0 %vm375_vm1, %v2296_v25 }
  0x3e   : > { %2066 = vmatprep.mubr.msk.bf16.mxu1 %vm375_vm1, %v2297_v26  ;;  %2118 = vmatprep.mubr.msk.bf16.mxu0 %vm375_vm1, %v2298_v27 }
  0x45   : > { %2067 = vmatmul.mubr.msk.bf16.gmra.mrb[20].mxu1 %vm375_vm1, %v2299_v28  ;;  %2119 = vmatmul.mubr.msk.bf16.gmra.mrb[4].mxu0 %vm375_vm1, %v2300_v29 }
  0x46   : > { %2070 = vmatprep.mubr.msk.bf16.mxu1 %vm375_vm1, %v2301_v30  ;;  %2122 = vmatprep.mubr.msk.bf16.mxu0 %vm375_vm1, %v2302_v31 }
  0x4d   : > { %2071 = vmatmul.mubr.msk.bf16.gmra.mrb[24].mxu1 %vm375_vm1, %v2303_v32  ;;  %2123 = vmatmul.mubr.msk.bf16.gmra.mrb[8].mxu0 %vm375_vm1, %v2304_v33 }
  0x4e   : > { %2074 = vmatprep.mubr.msk.bf16.mxu1 %vm375_vm1, %v2305_v34  ;;  %2126 = vmatprep.mubr.msk.bf16.mxu0 %vm375_vm1, %v2306_v35 }
  0x55   : > { %2075 = vmatmul.mubr.msk.bf16.gmra.mrb[28].mxu1 %vm375_vm1, %v2307_v36  ;;  %2127 = vmatmul.mubr.msk.bf16.gmra.mrb[12].mxu0 %vm375_vm1, %v2308_v37 }
  0x56   : > { %2096 = vmatprep.mubr.msk.bf16.mxu1 %vm375_vm1, %v2309_v38  ;;  %2130 = vmatprep.mubr.msk.bf16.mxu0 %vm375_vm1, %v2310_v39 }
  0x5d   : > { %2097 = vmatmul.mubr.msk.bf16.vlgmr.msra.gmra.mrb[16].mxu1 %vm375_vm1, %v2311_v40  ;;  %2131 = vmatmul.mubr.msk.bf16.gmra.mrb[16].mxu0 %vm375_vm1, %v2312_v41 }
  0x5e   : > { %2100 = vmatprep.mubr.msk.bf16.mxu1 %vm375_vm1, %v2313_v42  ;;  %2134 = vmatprep.mubr.msk.bf16.mxu0 %vm375_vm1, %v2314_v43 }
  0x65   : > { %2101 = vmatmul.mubr.msk.bf16.gmra.mrb[20].mxu1 %vm375_vm1, %v2315_v44  ;;  %2135 = vmatmul.mubr.msk.bf16.gmra.mrb[20].mxu0 %vm375_vm1, %v2316_v45 }
  0x66   : > { %2104 = vmatprep.mubr.msk.bf16.mxu1 %vm375_vm1, %v2317_v46  ;;  %2138 = vmatprep.mubr.msk.bf16.mxu0 %vm375_vm1, %v2318_v47 }
  0x6d   : > { %2105 = vmatmul.mubr.msk.bf16.gmra.mrb[24].mxu1 %vm375_vm1, %v2319_v48  ;;  %2139 = vmatmul.mubr.msk.bf16.gmra.mrb[24].mxu0 %vm375_vm1, %v2320_v49 }
  0x6e   : > { %2108 = vmatprep.mubr.msk.bf16.mxu1 %vm375_vm1, %v2321_v50  ;;  %2142 = vmatprep.mubr.msk.bf16.mxu0 %vm375_vm1, %v2322_v51 }
  0x75   : > { %2109 = vmatmul.mubr.msk.bf16.gmra.mrb[28].mxu1 %vm375_vm1, %v2323_v52  ;;  %2143 = vmatmul.mubr.msk.bf16.gmra.mrb[28].mxu0 %vm375_vm1, %v2324_v53 }
  0xf0   : > { %v2048_v54 = vpop.f32.mrb[0].mxu1 }
  0xf1   : > { %v462_v55 = vpop.f32.mrb[1].mxu1 }
  0xf2   : > { %v2049_v56 = vpop.f32.mrb[2].mxu1 }
  0xf3   : > { %v465_v57 = vpop.f32.mrb[3].mxu1 }
  0xf8   : > { %v2052_v58 = vpop.f32.mrb[4].mxu1 }
  0xf9   : > { %v478_v59 = vpop.f32.mrb[5].mxu1 }
  0xfa   : > { %v2053_v60 = vpop.f32.mrb[6].mxu1 }
  0xfb   : > { %v481_v61 = vpop.f32.mrb[7].mxu1 }
 0x100   : > { %v2056_v62 = vpop.f32.mrb[8].mxu1 }
 0x101   : > { %v2607_v63 = vpop.f32.mrb[9].mxu1 }
 0x102   : > { %v2609_v0 = vpop.f32.mrb[10].mxu1 }
 0x103   : > { %v2611_v1 = vpop.f32.mrb[11].mxu1 }
 0x108   : > { %v2613_v2 = vpop.f32.mrb[12].mxu1 }
 0x109   : > { %v2615_v3 = vpop.f32.mrb[13].mxu1 }
 0x10a   : > { %v2617_v4 = vpop.f32.mrb[14].mxu1 }
 0x10b   : > { %v2619_v5 = vpop.f32.mrb[15].mxu1 }
 0x110   : > { %v2116_v6 = vpop.f32.mrb[0].mxu0 }
 0x111   : > { %v2148_v8 = vadd.f32 %v2116_v6, %v2048_v54  ;;  %v1095_v9 = vpop.f32.mrb[1].mxu0 }
 0x112   : > { %v2149_v11 = vadd.f32 %v1095_v9, %v462_v55  ;;  %v2117_v12 = vpop.f32.mrb[2].mxu0 }
 0x113   : > { %v1263_v13 = vmul.f32 %v2148_v8, %v2624_v7  ;;  %v2150_v14 = vadd.f32 %v2117_v12, %v2049_v56  ;;  %v1098_v15 = vpop.f32.mrb[3].mxu0 }
 0x114   : > { %v1261_v16 = vmul.f32 %v2149_v11, %v2624_v7  ;;  %v2151_v17 = vadd.f32 %v1098_v15, %v465_v57 }
 0x115   : > { %v1302_v18 = vadd.f32 %v2629_v10, %v1263_v13  ;;  %v1264_v19 = vmul.f32 %v2150_v14, %v2624_v7 }
 0x116   : > { %v1300_v20 = vadd.f32 %v2629_v10, %v1261_v16  ;;  %v1262_v21 = vmul.f32 %v2151_v17, %v2624_v7 }
 0x117   : > { %v1334_v22 = vmax.f32 %v1302_v18, 0.0  ;;  %v1303_v23 = vadd.f32 %v2629_v10, %v1264_v19 }
 0x118   : > { %v1332_v24 = vmax.f32 %v1300_v20, 0.0  ;;  %v1301_v25 = vadd.f32 %v2629_v10, %v1262_v21  ;;  %v2120_v26 = vpop.f32.mrb[4].mxu0 }
 0x119   : > { %v1335_v27 = vmax.f32 %v1303_v23, 0.0  ;;  %v2152_v28 = vadd.f32 %v2120_v26, %v2052_v58  ;;  %v1111_v29 = vpop.f32.mrb[5].mxu0  ;;  %v1366_v33 = vmin.f32 %v1334_v22, 6.0 }
 0x11a   : > { %v1333_v30 = vmax.f32 %v1301_v25, 0.0  ;;  %v2153_v31 = vadd.f32 %v1111_v29, %v478_v59  ;;  %v2121_v32 = vpop.f32.mrb[6].mxu0  ;;  %v1364_v38 = vmin.f32 %v1332_v24, 6.0 }
 0x11b   : > { %v1367_v34 = vmin.f32 %v1335_v27, 6.0  ;;  %v1267_v35 = vmul.f32 %v2152_v28, %v2624_v7  ;;  %v2154_v36 = vadd.f32 %v2121_v32, %v2053_v60  ;;  %v1114_v37 = vpop.f32.mrb[7].mxu0 }
 0x11c   : > { %v1365_v39 = vmin.f32 %v1333_v30, 6.0  ;;  %v1265_v40 = vmul.f32 %v2153_v31, %v2624_v7  ;;  %v2155_v41 = vadd.f32 %v1114_v37, %v481_v61 }
 0x11d   : > { %v1906_v42 = vpack.c.bf16 %v1367_v34, %v1366_v33  ;;  %v1306_v43 = vadd.f32 %v2629_v10, %v1267_v35  ;;  %v1268_v44 = vmul.f32 %v2154_v36, %v2624_v7 }
 0x11e   : > { %v1901_v45 = vpack.c.bf16 %v1365_v39, %v1364_v38  ;;  %v1304_v46 = vadd.f32 %v2629_v10, %v1265_v40  ;;  %v1266_v47 = vmul.f32 %v2155_v41, %v2624_v7 }
 0x11f   : > { %1978 = vst [vmem:[%s2648_s30 + $0x8] sm:$0xff] %v1906_v42   ;;  %v1338_v48 = vmax.f32 %v1306_v43, 0.0  ;;  %v1307_v49 = vadd.f32 %v2629_v10, %v1268_v44 }
 0x120   : > { %1902 = vst [vmem:[%s2648_s30] sm:$0xff] %v1901_v45   ;;  %v1336_v50 = vmax.f32 %v1304_v46, 0.0  ;;  %v1305_v51 = vadd.f32 %v2629_v10, %v1266_v47  ;;  %v2124_v52 = vpop.f32.mrb[8].mxu0 }
 0x121   : > { %v1339_v53 = vmax.f32 %v1307_v49, 0.0  ;;  %v2156_v54 = vadd.f32 %v2124_v52, %v2056_v62  ;;  %v1127_v55 = vpop.f32.mrb[9].mxu0  ;;  %v1370_v59 = vmin.f32 %v1338_v48, 6.0 }
 0x122   : > { %v1337_v56 = vmax.f32 %v1305_v51, 0.0  ;;  %v2157_v57 = vadd.f32 %v1127_v55, %v2607_v63  ;;  %v2125_v58 = vpop.f32.mrb[10].mxu0  ;;  %v1368_v9 = vmin.f32 %v1336_v50, 6.0 }
 0x123   : > { %v1371_v60 = vmin.f32 %v1339_v53, 6.0  ;;  %v1271_v61 = vmul.f32 %v2156_v54, %v2624_v7  ;;  %v2158_v6 = vadd.f32 %v2125_v58, %v2609_v0  ;;  %v1130_v8 = vpop.f32.mrb[11].mxu0 }
 0x124   : > { %v1369_v11 = vmin.f32 %v1337_v56, 6.0  ;;  %v1269_v12 = vmul.f32 %v2157_v57, %v2624_v7  ;;  %v2159_v62 = vadd.f32 %v1130_v8, %v2611_v1 }
 0x125   : > { %v1916_v13 = vpack.c.bf16 %v1371_v60, %v1370_v59  ;;  %v1310_v14 = vadd.f32 %v2629_v10, %v1271_v61  ;;  %v1272_v63 = vmul.f32 %v2158_v6, %v2624_v7 }
 0x126   : > { %v1911_v15 = vpack.c.bf16 %v1369_v11, %v1368_v9  ;;  %v1308_v16 = vadd.f32 %v2629_v10, %v1269_v12  ;;  %v1270_v17 = vmul.f32 %v2159_v62, %v2624_v7 }
 0x127   : > { %1980 = vst [vmem:[%s2648_s30 + $0x18] sm:$0xff] %v1916_v13   ;;  %v1342_v18 = vmax.f32 %v1310_v14, 0.0  ;;  %v1311_v0 = vadd.f32 %v2629_v10, %v1272_v63 }
 0x128   : > { %1979 = vst [vmem:[%s2648_s30 + $0x10] sm:$0xff] %v1911_v15   ;;  %v1340_v19 = vmax.f32 %v1308_v16, 0.0  ;;  %v1309_v20 = vadd.f32 %v2629_v10, %v1270_v17  ;;  %v2128_v21 = vpop.f32.mrb[12].mxu0 }
 0x129   : > { %v1343_v1 = vmax.f32 %v1311_v0, 0.0  ;;  %v2160_v22 = vadd.f32 %v2128_v21, %v2613_v2  ;;  %v1143_v23 = vpop.f32.mrb[13].mxu0  ;;  %v1374_v27 = vmin.f32 %v1342_v18, 6.0 }
 0x12a   : > { %v1341_v24 = vmax.f32 %v1309_v20, 0.0  ;;  %v2161_v25 = vadd.f32 %v1143_v23, %v2615_v3  ;;  %v2129_v26 = vpop.f32.mrb[14].mxu0  ;;  %v1372_v32 = vmin.f32 %v1340_v19, 6.0 }
 0x12b   : > { %v1375_v28 = vmin.f32 %v1343_v1, 6.0  ;;  %v1275_v29 = vmul.f32 %v2160_v22, %v2624_v7  ;;  %v2162_v30 = vadd.f32 %v2129_v26, %v2617_v4  ;;  %v1146_v31 = vpop.f32.mrb[15].mxu0 }
 0x12c   : > { %v1373_v33 = vmin.f32 %v1341_v24, 6.0  ;;  %v1273_v34 = vmul.f32 %v2161_v25, %v2624_v7  ;;  %v2163_v2 = vadd.f32 %v1146_v31, %v2619_v5 }
 0x12d   : > { %v1926_v35 = vpack.c.bf16 %v1375_v28, %v1374_v27  ;;  %v1314_v36 = vadd.f32 %v2629_v10, %v1275_v29  ;;  %v1276_v3 = vmul.f32 %v2162_v30, %v2624_v7 }
 0x12e   : > { %v1921_v37 = vpack.c.bf16 %v1373_v33, %v1372_v32  ;;  %v1312_v38 = vadd.f32 %v2629_v10, %v1273_v34  ;;  %v1274_v39 = vmul.f32 %v2163_v2, %v2624_v7 }
 0x12f   : > { %1982 = vst [vmem:[%s2648_s30 + $0x28] sm:$0xff] %v1926_v35   ;;  %v1346_v4 = vmax.f32 %v1314_v36, 0.0  ;;  %v1315_v40 = vadd.f32 %v2629_v10, %v1276_v3 }
 0x130   : > { %v2098_v41 = vpop.f32.mrb[16].mxu1  ;;  %1981 = vst [vmem:[%s2648_s30 + $0x20] sm:$0xff] %v1921_v37   ;;  %v1344_v42 = vmax.f32 %v1312_v38, 0.0  ;;  %v1313_v43 = vadd.f32 %v2629_v10, %v1274_v39  ;;  %v2132_v5 = vpop.f32.mrb[16].mxu0 }
 0x131   : > { %v823_v44 = vpop.f32.mrb[17].mxu1  ;;  %v1347_v45 = vmax.f32 %v1315_v40, 0.0  ;;  %v2164_v46 = vadd.f32 %v2132_v5, %v2098_v41  ;;  %v1159_v47 = vpop.f32.mrb[17].mxu0  ;;  %v1378_v53 = vmin.f32 %v1346_v4, 6.0 }
 0x132   : > { %v2099_v48 = vpop.f32.mrb[18].mxu1  ;;  %v1345_v49 = vmax.f32 %v1313_v43, 0.0  ;;  %v2165_v50 = vadd.f32 %v1159_v47, %v823_v44  ;;  %v2133_v51 = vpop.f32.mrb[18].mxu0  ;;  %v1376_v58 = vmin.f32 %v1344_v42, 6.0 }
 0x133   : > { %v826_v52 = vpop.f32.mrb[19].mxu1  ;;  %v1379_v54 = vmin.f32 %v1347_v45, 6.0  ;;  %v1279_v55 = vmul.f32 %v2164_v46, %v2624_v7  ;;  %v2166_v56 = vadd.f32 %v2133_v51, %v2099_v48  ;;  %v1162_v57 = vpop.f32.mrb[19].mxu0 }
 0x134   : > { %v1377_v59 = vmin.f32 %v1345_v49, 6.0  ;;  %v1277_v60 = vmul.f32 %v2165_v50, %v2624_v7  ;;  %v2167_v61 = vadd.f32 %v1162_v57, %v826_v52 }
 0x135   : > { %v1936_v6 = vpack.c.bf16 %v1379_v54, %v1378_v53  ;;  %v1318_v8 = vadd.f32 %v2629_v10, %v1279_v55  ;;  %v1280_v9 = vmul.f32 %v2166_v56, %v2624_v7 }
 0x136   : > { %v1931_v11 = vpack.c.bf16 %v1377_v59, %v1376_v58  ;;  %v1316_v12 = vadd.f32 %v2629_v10, %v1277_v60  ;;  %v1278_v62 = vmul.f32 %v2167_v61, %v2624_v7 }
 0x137   : > { %1984 = vst [vmem:[%s2648_s30 + $0x38] sm:$0xff] %v1936_v6   ;;  %v1350_v13 = vmax.f32 %v1318_v8, 0.0  ;;  %v1319_v14 = vadd.f32 %v2629_v10, %v1280_v9 }
 0x138   : > { %v2102_v63 = vpop.f32.mrb[20].mxu1  ;;  %1983 = vst [vmem:[%s2648_s30 + $0x30] sm:$0xff] %v1931_v11   ;;  %v1348_v15 = vmax.f32 %v1316_v12, 0.0  ;;  %v1317_v16 = vadd.f32 %v2629_v10, %v1278_v62  ;;  %v2136_v17 = vpop.f32.mrb[20].mxu0 }
 0x139   : > { %v839_v18 = vpop.f32.mrb[21].mxu1  ;;  %v1351_v0 = vmax.f32 %v1319_v14, 0.0  ;;  %v2168_v19 = vadd.f32 %v2136_v17, %v2102_v63  ;;  %v1175_v20 = vpop.f32.mrb[21].mxu0  ;;  %v1382_v25 = vmin.f32 %v1350_v13, 6.0 }
 0x13a   : > { %v2103_v21 = vpop.f32.mrb[22].mxu1  ;;  %v1349_v1 = vmax.f32 %v1317_v16, 0.0  ;;  %v2169_v22 = vadd.f32 %v1175_v20, %v839_v18  ;;  %v2137_v23 = vpop.f32.mrb[22].mxu0  ;;  %v1380_v30 = vmin.f32 %v1348_v15, 6.0 }
 0x13b   : > { %v842_v24 = vpop.f32.mrb[23].mxu1  ;;  %v1383_v26 = vmin.f32 %v1351_v0, 6.0  ;;  %v1283_v27 = vmul.f32 %v2168_v19, %v2624_v7  ;;  %v2170_v28 = vadd.f32 %v2137_v23, %v2103_v21  ;;  %v1178_v29 = vpop.f32.mrb[23].mxu0 }
 0x13c   : > { %v1381_v31 = vmin.f32 %v1349_v1, 6.0  ;;  %v1281_v32 = vmul.f32 %v2169_v22, %v2624_v7  ;;  %v2171_v33 = vadd.f32 %v1178_v29, %v842_v24 }
 0x13d   : > { %v1946_v34 = vpack.c.bf16 %v1383_v26, %v1382_v25  ;;  %v1322_v2 = vadd.f32 %v2629_v10, %v1283_v27  ;;  %v1284_v35 = vmul.f32 %v2170_v28, %v2624_v7 }
 0x13e   : > { %v1941_v36 = vpack.c.bf16 %v1381_v31, %v1380_v30  ;;  %v1320_v3 = vadd.f32 %v2629_v10, %v1281_v32  ;;  %v1282_v37 = vmul.f32 %v2171_v33, %v2624_v7 }
 0x13f   : > { %1986 = vst [vmem:[%s2648_s30 + $0x48] sm:$0xff] %v1946_v34   ;;  %v1354_v38 = vmax.f32 %v1322_v2, 0.0  ;;  %v1323_v39 = vadd.f32 %v2629_v10, %v1284_v35 }
 0x140   : > { %v2106_v4 = vpop.f32.mrb[24].mxu1  ;;  %1985 = vst [vmem:[%s2648_s30 + $0x40] sm:$0xff] %v1941_v36   ;;  %v1352_v40 = vmax.f32 %v1320_v3, 0.0  ;;  %v1321_v41 = vadd.f32 %v2629_v10, %v1282_v37  ;;  %v2140_v42 = vpop.f32.mrb[24].mxu0 }
 0x141   : > { %v855_v43 = vpop.f32.mrb[25].mxu1  ;;  %v1355_v5 = vmax.f32 %v1323_v39, 0.0  ;;  %v2172_v44 = vadd.f32 %v2140_v42, %v2106_v4  ;;  %v1191_v45 = vpop.f32.mrb[25].mxu0  ;;  %v1386_v51 = vmin.f32 %v1354_v38, 6.0 }
 0x142   : > { %v2107_v46 = vpop.f32.mrb[26].mxu1  ;;  %v1353_v47 = vmax.f32 %v1321_v41, 0.0  ;;  %v2173_v48 = vadd.f32 %v1191_v45, %v855_v43  ;;  %v2141_v49 = vpop.f32.mrb[26].mxu0  ;;  %v1384_v56 = vmin.f32 %v1352_v40, 6.0 }
 0x143   : > { %v858_v50 = vpop.f32.mrb[27].mxu1  ;;  %v1387_v52 = vmin.f32 %v1355_v5, 6.0  ;;  %v1287_v53 = vmul.f32 %v2172_v44, %v2624_v7  ;;  %v2174_v54 = vadd.f32 %v2141_v49, %v2107_v46  ;;  %v1194_v55 = vpop.f32.mrb[27].mxu0 }
 0x144   : > { %v1385_v57 = vmin.f32 %v1353_v47, 6.0  ;;  %v1285_v58 = vmul.f32 %v2173_v48, %v2624_v7  ;;  %v2175_v59 = vadd.f32 %v1194_v55, %v858_v50 }
 0x145   : > { %v1956_v60 = vpack.c.bf16 %v1387_v52, %v1386_v51  ;;  %v1326_v61 = vadd.f32 %v2629_v10, %v1287_v53  ;;  %v1288_v6 = vmul.f32 %v2174_v54, %v2624_v7 }
 0x146   : > { %v1951_v8 = vpack.c.bf16 %v1385_v57, %v1384_v56  ;;  %v1324_v9 = vadd.f32 %v2629_v10, %v1285_v58  ;;  %v1286_v11 = vmul.f32 %v2175_v59, %v2624_v7 }
 0x147   : > { %1988 = vst [vmem:[%s2648_s30 + $0x58] sm:$0xff] %v1956_v60   ;;  %v1358_v12 = vmax.f32 %v1326_v61, 0.0  ;;  %v1327_v62 = vadd.f32 %v2629_v10, %v1288_v6 }
 0x148   : > { %v2110_v13 = vpop.f32.mrb[28].mxu1  ;;  %1987 = vst [vmem:[%s2648_s30 + $0x50] sm:$0xff] %v1951_v8   ;;  %v1356_v14 = vmax.f32 %v1324_v9, 0.0  ;;  %v1325_v63 = vadd.f32 %v2629_v10, %v1286_v11  ;;  %v2144_v15 = vpop.f32.mrb[28].mxu0 }
 0x149   : > { %v871_v16 = vpop.f32.mrb[29].mxu1  ;;  %v1359_v17 = vmax.f32 %v1327_v62, 0.0  ;;  %v2176_v18 = vadd.f32 %v2144_v15, %v2110_v13  ;;  %v1207_v0 = vpop.f32.mrb[29].mxu0  ;;  %v1390_v23 = vmin.f32 %v1358_v12, 6.0 }
 0x14a   : > { %v2111_v19 = vpop.f32.mrb[30].mxu1  ;;  %v1357_v20 = vmax.f32 %v1325_v63, 0.0  ;;  %v2177_v21 = vadd.f32 %v1207_v0, %v871_v16  ;;  %v2145_v1 = vpop.f32.mrb[30].mxu0  ;;  %v1388_v28 = vmin.f32 %v1356_v14, 6.0 }
 0x14b   : > { %v874_v22 = vpop.f32.mrb[31].mxu1  ;;  %v1391_v24 = vmin.f32 %v1359_v17, 6.0  ;;  %v1291_v25 = vmul.f32 %v2176_v18, %v2624_v7  ;;  %v2178_v26 = vadd.f32 %v2145_v1, %v2111_v19  ;;  %v1210_v27 = vpop.f32.mrb[31].mxu0 }
 0x14c   : > { %v1389_v29 = vmin.f32 %v1357_v20, 6.0  ;;  %v1289_v30 = vmul.f32 %v2177_v21, %v2624_v7  ;;  %v2179_v31 = vadd.f32 %v1210_v27, %v874_v22 }
 0x14d   : > { %v1966_v32 = vpack.c.bf16 %v1391_v24, %v1390_v23  ;;  %v1330_v33 = vadd.f32 %v2629_v10, %v1291_v25  ;;  %v1292_v34 = vmul.f32 %v2178_v26, %v2624_v7 }
 0x14e   : > { %v1961_v2 = vpack.c.bf16 %v1389_v29, %v1388_v28  ;;  %v1328_v35 = vadd.f32 %v2629_v10, %v1289_v30  ;;  %v1290_v36 = vmul.f32 %v2179_v31, %v2624_v7 }
 0x14f   : > { %1990 = vst [vmem:[%s2648_s30 + $0x68] sm:$0xff] %v1966_v32   ;;  %v1362_v3 = vmax.f32 %v1330_v33, 0.0  ;;  %v1331_v37 = vadd.f32 %v2629_v10, %v1292_v34 }
 0x150   : > { %1989 = vst [vmem:[%s2648_s30 + $0x60] sm:$0xff] %v1961_v2   ;;  %v1360_v38 = vmax.f32 %v1328_v35, 0.0  ;;  %v1329_v39 = vadd.f32 %v2629_v10, %v1290_v36 }
 0x151   : > { %v1363_v4 = vmax.f32 %v1331_v37, 0.0  ;;  %v1394_v41 = vmin.f32 %v1362_v3, 6.0 }
 0x152   : > { %v1361_v40 = vmax.f32 %v1329_v39, 0.0  ;;  %v1392_v43 = vmin.f32 %v1360_v38, 6.0 }
 0x153   : > { %v1395_v42 = vmin.f32 %v1363_v4, 6.0 }
 0x154   : > { %v1393_v7 = vmin.f32 %v1361_v40, 6.0 }
 0x155   : > { %v1976_v5 = vpack.c.bf16 %v1395_v42, %v1394_v41 }
 0x156   : > { %v1971_v10 = vpack.c.bf16 %v1393_v7, %v1392_v43 }
 0x157   : > { %1992 = vst [vmem:[%s2648_s30 + $0x78] sm:$0xff] %v1976_v5  }
 0x158   : > { %1991 = vst [vmem:[%s2648_s30 + $0x70] sm:$0xff] %v1971_v10  }
 0x159   : > { %2338 = shalt.err (!%p2335_p5)
}
 0x15a   : > { %s2339_s14 = scalar_lea.hbm %s2726_s9, 2048  ;;  %s2343_s24 = scalar_lea.hbm %s2784_s4, 4096 }
 0x15b   : > { %p2340_p6 = scmp.ne.s32.totalorder %s2726_s9, %s2339_s14  ;;  %p2344_p10 = scmp.lt.u32.totalorder %s2726_s9, %s2784_s4 }
 0x15c   : > { %p2345_p11 = scmp.lt.u32.totalorder %s2343_s24, %s2339_s14  ;;  %p2347_p13 = scmp.lt.u32.totalorder %s2339_s14, %s2726_s9 }
 0x15d   : > { %p2341_p7 = pnand %p2340_p6, %p2473_p4 }
 0x15e   : > { %p2346_p12 = por %p2345_p11, %p2344_p10 }
 0x15f   : > { %p2342_p9 = pneg %p2341_p7 }
 0x160   : > { %p2348_p0 = por %p2347_p13, %p2346_p12 }
 0x162   : > { %p2349_p1 = pnand %p2348_p0, %p2342_p9 }
 0x164   : > { %2352 = shalt.err (!%p2349_p1)
}
 0x165   : > { %s2406_s30 = smov 64   ;;  %s2407_s5 = smov 4  }
 0x166   : > { %2217 = dma.vmem_to_hbm [thread:$0]  (%p2473_p4), %s2728_s6, 2048, %s2726_s9, %s2734_s18, %s2406_s30, %s2406_s30, %s2407_s5  }
 0x167 PF: > { %p2223_p2 = scmp.ge.s32.totalorder %s2403_s20, 2  ;;  %s1586_s7 = sand.u32 1, %s2383_s15  }
 0x168   : > { %s1587_s8 = scalar_lea.sflag [#allocation3], %s1586_s7 }
 0x169   : > { %p2220_p3 = pnand %p2223_p2, %p2480_p8 }
 0x16b   : > { %2378 = dma.done.wait (!%p2220_p3), %s1587_s8, 2048  }
 0x16c   : > { %2380 = vsyncadd (!%p2220_p3), %s1587_s8, 4294965248  ;;  %s17_s20 = sadd.s32 1, %s2403_s20   ;;  %s2787_s15 = smov %s2387_s16 }
 0x16d   : > { %p14_p5 = scmp.ge.s32.totalorder %s17_s20, 4   ;;  %s2788_s16 = smov %s2391_s17 }
 0x16e   : > { %s2789_s17 = smov %s2486_s28  ;;  %s2790_s18 = smov %s2399_s19 }
 0x16f   : > { %s2791_s19 = smov %s2793_s23  ;;  %16 = sbr.rel (!%p14_p5) target bundleno = 4 (0x4), region = 76 }
 0x176   :  { %1592 = vsyncpa [#allocation3], 1 }
 0x177   :  { %1594 = vsyncpa [#allocation3 + $0x1], 1 }

</bundles_post_ra>
